<compile_context>
chip_gen: v7x
topology: tpu7x:2x2x1
jax: 0.10.0
libtpu: 0.0.40
codegen_flags: <defaults>
</compile_context>

<pallas_src>
from functools import partial

import jax
import jax.numpy as jnp
from jax.experimental import pallas as pl
from jax.experimental.pallas import tpu as pltpu

VAR_XY = 0.1             # cfg SSD encode variance (xy)
VAR_WH = 0.2             # cfg SSD encode variance (wh)
INV_VAR_XY = 1.0 / VAR_XY
INV_VAR_WH = 1.0 / VAR_WH
FP16_EPS = 0.0009765625  # torch.finfo(torch.float16).eps


# --------------------------------------------------------------------------
# Pallas kernel: per-image SSD loss terms, one whole-image tile per grid step
# --------------------------------------------------------------------------
def _ssd_loss_kernel(preg_ref, pcls_ref, anc_ref, gbox_ref, glab_ref,
                     ce_ref, stats_ref):
    preg = preg_ref[...]              # (4, HW) f32 regression head
    anc = anc_ref[...]                # (4, HW) f32: [a_x; a_y; 1/a_w; 1/a_h]
    gbox = gbox_ref[...]              # (4, HW) f32 matched GT ltrb
    glab = glab_ref[...]              # (1, HW) i32 matched GT label (0 = background)

    pos = glab > 0                    # (1, HW) positives
    mpos = pos.astype(jnp.float32)
    num_pos = jnp.sum(mpos)

    # ---- regression branch on (2,HW) slabs: ltrb -> xywh -> encode -> SL1 ----
    a_xy = anc[0:2]                   # (2, HW)
    inv_awh = anc[2:4]                # (2, HW) precomputed 1/a_wh (wrapper)

    g_lt = gbox[0:2]
    g_rb = gbox[2:4]
    g_xy = (g_lt + g_rb) * 0.5
    g_wh = g_rb - g_lt

    t_xy = (g_xy - a_xy) * inv_awh * INV_VAR_XY
    # log arg = 1.0 off-positives (log(aw/aw) == log(1) == 0); clamp degenerate GT.
    ratio = jnp.where(pos, jnp.maximum(g_wh * inv_awh, 1e-8), 1.0)
    t_wh = jnp.log(ratio) * INV_VAR_WH

    def _smooth_l1(d):
        ad = jnp.abs(d)
        return jnp.where(ad < 1.0, 0.5 * d * d, ad - 0.5)

    sl1 = _smooth_l1(preg[0:2] - t_xy) + _smooth_l1(preg[2:4] - t_wh)  # (2, HW)
    box_sum = jnp.sum(sl1 * mpos)

    # ---- classification branch: per-anchor cross entropy (all in f32) ----
    pcls = pcls_ref[...]                                   # (C1, HW) f32
    m = jnp.max(pcls, axis=0, keepdims=True)
    # TODO(synk): bf16 exp here is a ~2x EUP lever on v6e/v7x once BW-bound is fixed.
    lse = jnp.log(jnp.sum(jnp.exp(pcls - m), axis=0, keepdims=True)) + m
    cls_ids = jax.lax.broadcasted_iota(jnp.int32, pcls.shape, 0)
    sel = jnp.sum(jnp.where(cls_ids == glab, pcls, 0.0), axis=0, keepdims=True)
    ce = lse - sel                                         # (1, HW)
    conf_pos_sum = jnp.sum(ce * mpos)

    ce_ref[...] = ce

    # Per-image stats written once (single vreg; lane-iota select).
    lane = jax.lax.broadcasted_iota(jnp.int32, (1, 128), 1)
    stats_ref[...] = (jnp.where(lane == 0, box_sum, 0.0)
                      + jnp.where(lane == 1, num_pos, 0.0)
                      + jnp.where(lane == 2, conf_pos_sum, 0.0))


def ssd_loss_pallas_call(preg, pcls, anc_enc, gbox_ltrb, glabel):
    """One whole-image tile per grid step (grid = (B,)); no HBM padding passes."""
    B, _, HW = preg.shape
    C1 = pcls.shape[1]

    ce, stats = pl.pallas_call(
        _ssd_loss_kernel,
        out_shape=(jax.ShapeDtypeStruct((B, 1, HW), jnp.float32),
                   jax.ShapeDtypeStruct((B, 1, 128), jnp.float32)),
        grid_spec=pltpu.PrefetchScalarGridSpec(
            num_scalar_prefetch=0,
            grid=(B,),
            in_specs=[
                pl.BlockSpec((None, 4, HW), lambda b: (b, 0, 0)),    # preg
                pl.BlockSpec((None, C1, HW), lambda b: (b, 0, 0)),   # pcls (f32)
                pl.BlockSpec((4, HW), lambda b: (0, 0)),             # anchor consts
                pl.BlockSpec((None, 4, HW), lambda b: (b, 0, 0)),    # matched gbox
                pl.BlockSpec((None, 1, HW), lambda b: (b, 0, 0)),    # matched glabel
            ],
            out_specs=[
                pl.BlockSpec((None, 1, HW), lambda b: (b, 0, 0)),    # per-anchor CE
                pl.BlockSpec((None, 1, 128), lambda b: (b, 0, 0)),   # per-image stats
            ],
        ),
        compiler_params=pltpu.CompilerParams(
            dimension_semantics=("parallel",),          # batch across TCs (v7x)
            vmem_limit_bytes=48 * 1024 * 1024),         # headroom on v7x (64 MiB)
    )(preg, pcls, anc_enc, gbox_ltrb, glabel)

    return ce[:, 0, :], stats[:, 0, :]


# --------------------------------------------------------------------------
# JAX glue: vmapped anchor/GT matching (matchs_gt_b, 'iou' mode) and OHEM
# --------------------------------------------------------------------------
def xywh2ltrb(xywh):
    cxy, wh = xywh[:, :2], xywh[:, 2:]
    return jnp.concatenate([cxy - wh * 0.5, cxy + wh * 0.5], axis=-1)


def iou_ltrb(a, b):  # a: (HW,4), b: (NG,4)
    lt = jnp.maximum(a[:, None, :2], b[None, :, :2])
    rb = jnp.minimum(a[:, None, 2:], b[None, :, 2:])
    wh = jnp.clip(rb - lt, 0.0)
    inter = wh[..., 0] * wh[..., 1]
    area_a = (a[:, 2] - a[:, 0]) * (a[:, 3] - a[:, 1])
    area_b = (b[:, 2] - b[:, 0]) * (b[:, 3] - b[:, 1])
    return inter / (area_a[:, None] + area_b[None, :] - inter + 1e-12)


def match_targets(ancs_xywh, gt_boxes, gt_labels, gt_valid, pos_iou_thresh=0.5):
    """Vmapped matching over a fixed-size padded GT tensor (no Python batch loop).

    NOTE: if two GTs share the same best anchor the scatter is last-writer-wins
    (same corner-case ambiguity as the original torch matching)."""
    anc_ltrb = xywh2ltrb(ancs_xywh)                  # (HW, 4)
    HW = anc_ltrb.shape[0]

    def one(gtb, gtl, gtv):
        ng = gtb.shape[0]
        iou = iou_ltrb(anc_ltrb, gtb)                # (HW, NG)
        iou = jnp.where(gtv[None, :], iou, -1.0)     # never match padded GTs
        boxes_index = jnp.argmax(iou, axis=1)        # (HW,)
        best_iou = jnp.max(iou, axis=1)
        best_anc_per_gt = jnp.argmax(iou, axis=0)    # (NG,)
        scatter_idx = jnp.where(gtv, best_anc_per_gt, HW)   # OOB => dropped
        boxes_index = boxes_index.at[scatter_idx].set(
            jnp.arange(ng, dtype=boxes_index.dtype), mode='drop')
        best_iou = best_iou.at[scatter_idx].set(2.0, mode='drop')  # force match
        mask_pos = best_iou >= pos_iou_thresh
        glab = jnp.where(mask_pos, gtl[boxes_index].astype(jnp.int32), 0)
        gbox = gtb[boxes_index]                      # (HW, 4)
        return gbox.T, glab[None]                    # (4,HW) f32, (1,HW) i32

    return jax.vmap(one)(gt_boxes, gt_labels, gt_valid)


def prepare_targets(targets):
    """Host-side: pad the ragged GT list to (B, NGmax, ...) arrays."""
    ng_max = max(t['boxes'].shape[0] for t in targets)
    boxes, labels, valid = [], [], []
    for t in targets:
        ng = t['boxes'].shape[0]
        pad = ng_max - ng
        boxes.append(jnp.pad(t['boxes'], ((0, pad), (0, 0))))
        labels.append(jnp.pad(t['labels'], ((0, pad),)))
        valid.append(jnp.concatenate(
            [jnp.ones((ng,), bool), jnp.zeros((pad,), bool)]))
    return jnp.stack(boxes), jnp.stack(labels), jnp.stack(valid)


@jax.jit
def loss_ssd_forward(preg, pcls, ancs_xywh, gt_boxes, gt_labels, gt_valid):
    gbox_ltrb, glabel = match_targets(ancs_xywh, gt_boxes, gt_labels, gt_valid)

    # Anchor-derived constants are training-run constants: precompute [xy; 1/wh]
    # once here (tiny), so the kernel does no reciprocals.
    anc_enc = jnp.concatenate(
        [ancs_xywh[:, :2], 1.0 / ancs_xywh[:, 2:]], axis=-1).T      # (4, HW)

    ce, stats = ssd_loss_pallas_call(preg, pcls, anc_enc, gbox_ltrb, glabel)
    box_sum, num_pos, conf_pos_sum = stats[:, 0], stats[:, 1], stats[:, 2]
    nums_pos = jnp.maximum(num_pos, FP16_EPS)

    # l_box over all positives in the batch (clamped denominator, no NaN at 0 pos).
    l_box = jnp.sum(box_sum) / jnp.maximum(jnp.sum(num_pos), FP16_EPS)

    # OHEM hard-negative mining.
    # TODO(synk): the top-k/argsort has no clean Pallas TPU equivalent; done in JAX
    # glue with a single argsort + inverse-permutation scatter (exact rank).
    B, HW = ce.shape
    pos2d = glabel[:, 0, :] > 0
    ce_neg = jnp.where(pos2d, 0.0, ce)
    order = jnp.argsort(-ce_neg, axis=-1)
    rank = jnp.zeros((B, HW), jnp.int32).at[
        jnp.arange(B)[:, None], order].set(
            jnp.broadcast_to(jnp.arange(HW, dtype=jnp.int32)[None, :], (B, HW)))
    mask_neg_hard = rank < (nums_pos * 3.0)[:, None]

    l_conf_pos = jnp.mean(conf_pos_sum / nums_pos)
    l_conf_neg = jnp.mean(jnp.sum(ce * mask_neg_hard, axis=-1) / nums_pos)

    l_total = l_box + l_conf_pos + l_conf_neg
    # Keep log values on-device (no float() host sync inside the loss).
    log_dict = {'l_total': l_total, 'l_conf_pos': l_conf_pos,
                'l_conf_neg': l_conf_neg, 'l_box': l_box}
    return l_total, log_dict


# --------------------------------------------------------------------------
# Pure-JAX reference (same math, no Pallas) for validation
# --------------------------------------------------------------------------
def loss_from_matched_ref(preg, pcls, ancs_xywh, gbox_ltrb, glabel):
    pos2d = glabel[:, 0, :] > 0
    mpos = pos2d.astype(jnp.float32)
    ax, ay, aw, ah = [ancs_xywh[:, i][None] for i in range(4)]
    gl, gt_, gr, gb = [gbox_ltrb[:, i, :] for i in range(4)]
    gx, gy = (gl + gr) * 0.5, (gt_ + gb) * 0.5
    gw, gh = gr - gl, gb - gt_
    gw = jnp.where(pos2d, gw, jnp.broadcast_to(aw, gw.shape))
    gh = jnp.where(pos2d, gh, jnp.broadcast_to(ah, gh.shape))
    tx, ty = (gx - ax) / aw / VAR_XY, (gy - ay) / ah / VAR_XY
    tw, th = jnp.log(gw / aw) / VAR_WH, jnp.log(gh / ah) / VAR_WH
    gt_enc = jnp.stack([tx, ty, tw, th], axis=1)
    d = preg - gt_enc
    ad = jnp.abs(d)
    sl1 = jnp.where(ad < 1.0, 0.5 * d * d, ad - 0.5)
    box_per = jnp.sum(sl1, axis=1)
    num_pos = jnp.sum(mpos, axis=-1)
    nums_pos = jnp.maximum(num_pos, FP16_EPS)
    l_box = jnp.sum(box_per * mpos) / jnp.maximum(jnp.sum(num_pos), FP16_EPS)
    lse = jax.scipy.special.logsumexp(pcls, axis=1)
    sel = jnp.take_along_axis(pcls, glabel, axis=1)[:, 0, :]
    ce = lse - sel
    l_conf_pos = jnp.mean(jnp.sum(ce * mpos, axis=-1) / nums_pos)
    ce_neg = jnp.where(pos2d, 0.0, ce)
    rank = jnp.argsort(jnp.argsort(-ce_neg, axis=-1), axis=-1)  # original double argsort
    mask_neg_hard = rank < (nums_pos * 3.0)[:, None]
    l_conf_neg = jnp.mean(jnp.sum(ce * mask_neg_hard, axis=-1) / nums_pos)
    return l_box + l_conf_pos + l_conf_neg


if __name__ == "__main__":
    key = jax.random.PRNGKey(0)
    B, HW, NUM_CLASSES = 2, 600, 3   # small synthetic shapes (real SSD: HW=8732)
    C1 = NUM_CLASSES + 1
    k1, k2, k3, k4, k5 = jax.random.split(key, 5)

    preg = jax.random.normal(k1, (B, 4, HW), jnp.float32) * 0.1
    pcls = jax.random.normal(k2, (B, C1, HW), jnp.float32)
    cxy = jax.random.uniform(k3, (HW, 2), minval=0.05, maxval=0.95)
    wh = jax.random.uniform(k4, (HW, 2), minval=0.05, maxval=0.3)
    ancs_xywh = jnp.concatenate([cxy, wh], axis=-1).astype(jnp.float32)

    targets = []
    for b in range(B):
        ng = 2 + b   # ragged GT counts exercise the padded/vmapped matching path
        kk = jax.random.fold_in(k5, b)
        ka, kb, kc = jax.random.split(kk, 3)
        xy = jax.random.uniform(ka, (ng, 2), minval=0.1, maxval=0.6)
        whg = jax.random.uniform(kb, (ng, 2), minval=0.15, maxval=0.35)
        boxes = jnp.concatenate([xy, xy + whg], axis=-1).astype(jnp.float32)
        labels = jax.random.randint(kc, (ng,), 1, NUM_CLASSES + 1).astype(jnp.float32)
        targets.append({'boxes': boxes, 'labels': labels})

    gt_boxes, gt_labels, gt_valid = prepare_targets(targets)

    # HW=600 is deliberately not a multiple of 128: exercises the whole-image
    # (full-dim last block) path with zero wrapper-side padding.
    l_total, log_dict = loss_ssd_forward(preg, pcls, ancs_xywh,
                                         gt_boxes, gt_labels, gt_valid)
    l_total = jax.block_until_ready(l_total)

    # Validate against a pure-JAX reference (identical f32 logits, no bf16 cast).
    gbox_ltrb, glabel = match_targets(ancs_xywh, gt_boxes, gt_labels, gt_valid)
    l_ref = loss_from_matched_ref(preg, pcls, ancs_xywh, gbox_ltrb, glabel)

    assert jnp.isfinite(l_total)
    assert jnp.allclose(l_total, l_ref, rtol=1e-4, atol=1e-5), (float(l_total), float(l_ref))
    print("KERNEL_OK")
</pallas_src>

<mosaic_0001>
module attributes {stable_mosaic.version = 11 : i64} {
  func.func @_ssd_loss_kernel(%arg0: i32, %arg1: memref<1x4x600xf32, #tpu.memory_space<vmem>>, %arg2: memref<1x4x600xf32, #tpu.memory_space<vmem>>, %arg3: memref<4x600xf32, #tpu.memory_space<vmem>>, %arg4: memref<1x4x600xf32, #tpu.memory_space<vmem>>, %arg5: memref<1x1x600xi32, #tpu.memory_space<vmem>>, %arg6: memref<1x1x600xf32, #tpu.memory_space<vmem>>, %arg7: memref<1x1x128xf32, #tpu.memory_space<vmem>>) attributes {dimension_semantics = [#tpu.dimension_semantics<parallel>], iteration_bounds = array<i64: 2>, scalar_prefetch = 0 : i64, scratch_operands = 0 : i64, tpu.core_type = #tpu.core_type<tc>, window_params = [{transform_indices = @transform_0, window_bounds = array<i64: 1, 4, 600>}, {transform_indices = @transform_1, window_bounds = array<i64: 1, 4, 600>}, {pipeline_mode = #tpu.pipeline_mode<synchronous>, transform_indices = @transform_2, window_bounds = array<i64: 4, 600>}, {transform_indices = @transform_3, window_bounds = array<i64: 1, 4, 600>}, {transform_indices = @transform_4, window_bounds = array<i64: 1, 1, 600>}, {transform_indices = @transform_5, window_bounds = array<i64: 1, 1, 600>}, {transform_indices = @transform_6, window_bounds = array<i64: 1, 1, 128>}]} {
    %c0 = arith.constant 0 : index
    %c0_0 = arith.constant 0 : index
    %c0_1 = arith.constant 0 : index
    %0 = vector.load %arg1[%c0, %c0_0, %c0_1] : memref<1x4x600xf32, #tpu.memory_space<vmem>>, vector<1x4x600xf32>
    %1 = vector.shape_cast %0 : vector<1x4x600xf32> to vector<4x600xf32>
    %c0_2 = arith.constant 0 : index
    %c0_3 = arith.constant 0 : index
    %2 = vector.load %arg3[%c0_2, %c0_3] : memref<4x600xf32, #tpu.memory_space<vmem>>, vector<4x600xf32>
    %c0_4 = arith.constant 0 : index
    %c0_5 = arith.constant 0 : index
    %c0_6 = arith.constant 0 : index
    %3 = vector.load %arg4[%c0_4, %c0_5, %c0_6] : memref<1x4x600xf32, #tpu.memory_space<vmem>>, vector<1x4x600xf32>
    %4 = vector.shape_cast %3 : vector<1x4x600xf32> to vector<4x600xf32>
    %c0_7 = arith.constant 0 : index
    %c0_8 = arith.constant 0 : index
    %c0_9 = arith.constant 0 : index
    %5 = vector.load %arg5[%c0_7, %c0_8, %c0_9] : memref<1x1x600xi32, #tpu.memory_space<vmem>>, vector<1x1x600xi32>
    %6 = vector.shape_cast %5 : vector<1x1x600xi32> to vector<1x600xi32>
    %c0_i32 = arith.constant 0 : i32
    %7 = vector.broadcast %c0_i32 : i32 to vector<1x600xi32>
    %8 = arith.cmpi sgt, %6, %7 : vector<1x600xi32>
    %9 = arith.extui %8 : vector<1x600xi1> to vector<1x600xi32>
    %10 = arith.sitofp %9 : vector<1x600xi32> to vector<1x600xf32>
    %11 = vector.shape_cast %10 : vector<1x600xf32> to vector<1x1x600xf32>
    %cst = arith.constant dense<0.000000e+00> : vector<1xf32>
    %12 = vector.multi_reduction <add>, %11, %cst [1, 2] : vector<1x1x600xf32> to vector<1xf32>
    %13 = vector.shape_cast %12 : vector<1xf32> to vector<1x1x1xf32>
    %14 = vector.extract %13[0, 0, 0] : f32 from vector<1x1x1xf32>
    %15 = vector.extract_strided_slice %2 {offsets = [0, 0], sizes = [2, 600], strides = [1, 1]} : vector<4x600xf32> to vector<2x600xf32>
    %16 = vector.extract_strided_slice %2 {offsets = [2, 0], sizes = [2, 600], strides = [1, 1]} : vector<4x600xf32> to vector<2x600xf32>
    %17 = vector.extract_strided_slice %4 {offsets = [0, 0], sizes = [2, 600], strides = [1, 1]} : vector<4x600xf32> to vector<2x600xf32>
    %18 = vector.extract_strided_slice %4 {offsets = [2, 0], sizes = [2, 600], strides = [1, 1]} : vector<4x600xf32> to vector<2x600xf32>
    %19 = arith.addf %17, %18 : vector<2x600xf32>
    %cst_10 = arith.constant 5.000000e-01 : f32
    %20 = vector.broadcast %cst_10 : f32 to vector<2x600xf32>
    %21 = arith.mulf %19, %20 : vector<2x600xf32>
    %22 = arith.subf %18, %17 : vector<2x600xf32>
    %23 = arith.subf %21, %15 : vector<2x600xf32>
    %24 = arith.mulf %23, %16 : vector<2x600xf32>
    %cst_11 = arith.constant 1.000000e+01 : f32
    %25 = vector.broadcast %cst_11 : f32 to vector<2x600xf32>
    %26 = arith.mulf %24, %25 : vector<2x600xf32>
    %27 = arith.mulf %22, %16 : vector<2x600xf32>
    %cst_12 = arith.constant 9.99999993E-9 : f32
    %28 = vector.broadcast %cst_12 : f32 to vector<2x600xf32>
    %29 = arith.maximumf %27, %28 : vector<2x600xf32>
    %cst_13 = arith.constant 1.000000e+00 : f32
    %30 = vector.shape_cast %8 : vector<1x600xi1> to vector<1x600xi1>
    %31 = vector.broadcast %30 : vector<1x600xi1> to vector<2x600xi1>
    %32 = vector.broadcast %cst_13 : f32 to vector<2x600xf32>
    %33 = arith.select %31, %29, %32 : vector<2x600xi1>, vector<2x600xf32>
    %34 = math.log %33 : vector<2x600xf32>
    %cst_14 = arith.constant 5.000000e+00 : f32
    %35 = vector.broadcast %cst_14 : f32 to vector<2x600xf32>
    %36 = arith.mulf %34, %35 : vector<2x600xf32>
    %37 = vector.extract_strided_slice %1 {offsets = [0, 0], sizes = [2, 600], strides = [1, 1]} : vector<4x600xf32> to vector<2x600xf32>
    %38 = arith.subf %37, %26 : vector<2x600xf32>
    %39 = math.absf %38 : vector<2x600xf32>
    %cst_15 = arith.constant 1.000000e+00 : f32
    %40 = vector.broadcast %cst_15 : f32 to vector<2x600xf32>
    %41 = arith.cmpf olt, %39, %40 : vector<2x600xf32>
    %cst_16 = arith.constant 5.000000e-01 : f32
    %42 = vector.broadcast %cst_16 : f32 to vector<2x600xf32>
    %43 = arith.mulf %42, %38 : vector<2x600xf32>
    %44 = arith.mulf %43, %38 : vector<2x600xf32>
    %cst_17 = arith.constant 5.000000e-01 : f32
    %45 = vector.broadcast %cst_17 : f32 to vector<2x600xf32>
    %46 = arith.subf %39, %45 : vector<2x600xf32>
    %47 = arith.select %41, %44, %46 : vector<2x600xi1>, vector<2x600xf32>
    %48 = vector.extract_strided_slice %1 {offsets = [2, 0], sizes = [2, 600], strides = [1, 1]} : vector<4x600xf32> to vector<2x600xf32>
    %49 = arith.subf %48, %36 : vector<2x600xf32>
    %50 = math.absf %49 : vector<2x600xf32>
    %cst_18 = arith.constant 1.000000e+00 : f32
    %51 = vector.broadcast %cst_18 : f32 to vector<2x600xf32>
    %52 = arith.cmpf olt, %50, %51 : vector<2x600xf32>
    %cst_19 = arith.constant 5.000000e-01 : f32
    %53 = vector.broadcast %cst_19 : f32 to vector<2x600xf32>
    %54 = arith.mulf %53, %49 : vector<2x600xf32>
    %55 = arith.mulf %54, %49 : vector<2x600xf32>
    %cst_20 = arith.constant 5.000000e-01 : f32
    %56 = vector.broadcast %cst_20 : f32 to vector<2x600xf32>
    %57 = arith.subf %50, %56 : vector<2x600xf32>
    %58 = arith.select %52, %55, %57 : vector<2x600xi1>, vector<2x600xf32>
    %59 = arith.addf %47, %58 : vector<2x600xf32>
    %60 = vector.broadcast %10 : vector<1x600xf32> to vector<2x600xf32>
    %61 = arith.mulf %59, %60 : vector<2x600xf32>
    %62 = vector.shape_cast %61 : vector<2x600xf32> to vector<1x2x600xf32>
    %cst_21 = arith.constant dense<0.000000e+00> : vector<1xf32>
    %63 = vector.multi_reduction <add>, %62, %cst_21 [1, 2] : vector<1x2x600xf32> to vector<1xf32>
    %64 = vector.shape_cast %63 : vector<1xf32> to vector<1x1x1xf32>
    %65 = vector.extract %64[0, 0, 0] : f32 from vector<1x1x1xf32>
    %c0_22 = arith.constant 0 : index
    %c0_23 = arith.constant 0 : index
    %c0_24 = arith.constant 0 : index
    %66 = vector.load %arg2[%c0_22, %c0_23, %c0_24] : memref<1x4x600xf32, #tpu.memory_space<vmem>>, vector<1x4x600xf32>
    %67 = vector.shape_cast %66 : vector<1x4x600xf32> to vector<4x600xf32>
    %cst_25 = arith.constant dense<0xFF800000> : vector<600xf32>
    %68 = vector.multi_reduction <maximumf>, %67, %cst_25 [0] : vector<4x600xf32> to vector<600xf32>
    %69 = vector.shape_cast %68 : vector<600xf32> to vector<1x600xf32>
    %70 = vector.broadcast %69 : vector<1x600xf32> to vector<4x600xf32>
    %71 = arith.subf %67, %70 : vector<4x600xf32>
    %72 = math.exp %71 : vector<4x600xf32>
    %cst_26 = arith.constant dense<0.000000e+00> : vector<600xf32>
    %73 = vector.multi_reduction <add>, %72, %cst_26 [0] : vector<4x600xf32> to vector<600xf32>
    %74 = vector.shape_cast %73 : vector<600xf32> to vector<1x600xf32>
    %75 = math.log %74 : vector<1x600xf32>
    %76 = arith.addf %75, %69 : vector<1x600xf32>
    %77 = tpu.iota {dimensions = array<i32: 0>} : vector<4x600xi32>
    %78 = vector.broadcast %6 : vector<1x600xi32> to vector<4x600xi32>
    %79 = arith.cmpi eq, %77, %78 : vector<4x600xi32>
    %cst_27 = arith.constant 0.000000e+00 : f32
    %80 = vector.broadcast %cst_27 : f32 to vector<4x600xf32>
    %81 = arith.select %79, %67, %80 : vector<4x600xi1>, vector<4x600xf32>
    %cst_28 = arith.constant dense<0.000000e+00> : vector<600xf32>
    %82 = vector.multi_reduction <add>, %81, %cst_28 [0] : vector<4x600xf32> to vector<600xf32>
    %83 = vector.shape_cast %82 : vector<600xf32> to vector<1x600xf32>
    %84 = arith.subf %76, %83 : vector<1x600xf32>
    %85 = arith.mulf %84, %10 : vector<1x600xf32>
    %86 = vector.shape_cast %85 : vector<1x600xf32> to vector<1x1x600xf32>
    %cst_29 = arith.constant dense<0.000000e+00> : vector<1xf32>
    %87 = vector.multi_reduction <add>, %86, %cst_29 [1, 2] : vector<1x1x600xf32> to vector<1xf32>
    %88 = vector.shape_cast %87 : vector<1xf32> to vector<1x1x1xf32>
    %89 = vector.extract %88[0, 0, 0] : f32 from vector<1x1x1xf32>
    %c0_30 = arith.constant 0 : index
    %c0_31 = arith.constant 0 : index
    %c0_32 = arith.constant 0 : index
    %90 = vector.load %arg6[%c0_30, %c0_31, %c0_32] : memref<1x1x600xf32, #tpu.memory_space<vmem>>, vector<1x1x600xf32>
    %91 = vector.shape_cast %90 : vector<1x1x600xf32> to vector<1x600xf32>
    %92 = vector.shape_cast %84 : vector<1x600xf32> to vector<1x1x600xf32>
    tpu.vector_store %arg6[%c0_30, %c0_31, %c0_32], %92 {strides = array<i32>} : memref<1x1x600xf32, #tpu.memory_space<vmem>>, vector<1x1x600xf32>,
    %93 = tpu.iota {dimensions = array<i32: 1>} : vector<1x128xi32>
    %c0_i32_33 = arith.constant 0 : i32
    %94 = vector.broadcast %c0_i32_33 : i32 to vector<1x128xi32>
    %95 = arith.cmpi eq, %93, %94 : vector<1x128xi32>
    %cst_34 = arith.constant 0.000000e+00 : f32
    %96 = vector.broadcast %65 : f32 to vector<1x128xf32>
    %97 = vector.broadcast %cst_34 : f32 to vector<1x128xf32>
    %98 = arith.select %95, %96, %97 : vector<1x128xi1>, vector<1x128xf32>
    %c1_i32 = arith.constant 1 : i32
    %99 = vector.broadcast %c1_i32 : i32 to vector<1x128xi32>
    %100 = arith.cmpi eq, %93, %99 : vector<1x128xi32>
    %cst_35 = arith.constant 0.000000e+00 : f32
    %101 = vector.broadcast %14 : f32 to vector<1x128xf32>
    %102 = vector.broadcast %cst_35 : f32 to vector<1x128xf32>
    %103 = arith.select %100, %101, %102 : vector<1x128xi1>, vector<1x128xf32>
    %104 = arith.addf %98, %103 : vector<1x128xf32>
    %c2_i32 = arith.constant 2 : i32
    %105 = vector.broadcast %c2_i32 : i32 to vector<1x128xi32>
    %106 = arith.cmpi eq, %93, %105 : vector<1x128xi32>
    %cst_36 = arith.constant 0.000000e+00 : f32
    %107 = vector.broadcast %89 : f32 to vector<1x128xf32>
    %108 = vector.broadcast %cst_36 : f32 to vector<1x128xf32>
    %109 = arith.select %106, %107, %108 : vector<1x128xi1>, vector<1x128xf32>
    %110 = arith.addf %104, %109 : vector<1x128xf32>
    %c0_37 = arith.constant 0 : index
    %c0_38 = arith.constant 0 : index
    %c0_39 = arith.constant 0 : index
    %111 = vector.load %arg7[%c0_37, %c0_38, %c0_39] : memref<1x1x128xf32, #tpu.memory_space<vmem>>, vector<1x1x128xf32>
    %112 = vector.shape_cast %111 : vector<1x1x128xf32> to vector<1x128xf32>
    %113 = vector.shape_cast %110 : vector<1x128xf32> to vector<1x1x128xf32>
    tpu.vector_store %arg7[%c0_37, %c0_38, %c0_39], %113 {strides = array<i32>} : memref<1x1x128xf32, #tpu.memory_space<vmem>>, vector<1x1x128xf32>,
    return
  }
  func.func @transform_0(%arg0: i32) -> (i32, i32, i32) {
    %c0_i32 = arith.constant 0 : i32
    %c0_i32_0 = arith.constant 0 : i32
    %c0_i32_1 = arith.constant 0 : i32
    return %arg0, %c0_i32, %c0_i32_0 : i32, i32, i32
  }
  func.func @transform_1(%arg0: i32) -> (i32, i32, i32) {
    %c0_i32 = arith.constant 0 : i32
    %c0_i32_0 = arith.constant 0 : i32
    %c0_i32_1 = arith.constant 0 : i32
    return %arg0, %c0_i32, %c0_i32_0 : i32, i32, i32
  }
  func.func @transform_2(%arg0: i32) -> (i32, i32) {
    %c0_i32 = arith.constant 0 : i32
    %c0_i32_0 = arith.constant 0 : i32
    %c0_i32_1 = arith.constant 0 : i32
    return %c0_i32, %c0_i32_0 : i32, i32
  }
  func.func @transform_3(%arg0: i32) -> (i32, i32, i32) {
    %c0_i32 = arith.constant 0 : i32
    %c0_i32_0 = arith.constant 0 : i32
    %c0_i32_1 = arith.constant 0 : i32
    return %arg0, %c0_i32, %c0_i32_0 : i32, i32, i32
  }
  func.func @transform_4(%arg0: i32) -> (i32, i32, i32) {
    %c0_i32 = arith.constant 0 : i32
    %c0_i32_0 = arith.constant 0 : i32
    %c0_i32_1 = arith.constant 0 : i32
    return %arg0, %c0_i32, %c0_i32_0 : i32, i32, i32
  }
  func.func @transform_5(%arg0: i32) -> (i32, i32, i32) {
    %c0_i32 = arith.constant 0 : i32
    %c0_i32_0 = arith.constant 0 : i32
    %c0_i32_1 = arith.constant 0 : i32
    return %arg0, %c0_i32, %c0_i32_0 : i32, i32, i32
  }
  func.func @transform_6(%arg0: i32) -> (i32, i32, i32) {
    %c0_i32 = arith.constant 0 : i32
    %c0_i32_0 = arith.constant 0 : i32
    %c0_i32_1 = arith.constant 0 : i32
    return %arg0, %c0_i32, %c0_i32_0 : i32, i32, i32
  }
}

</mosaic_0001>

<bundles_post_ra>
// kernel: loss_ssd_forward.1
= control target key start
LH: loop header
LB: loop body
LE: loop exit
PB: predicated region body
PF: predicated region fallthrough
CT: control target
= control target key end

     0   :  { %s1097_s21 = smov 0   ;;  %s1476_s0 = inlined_call_operand.vmem [shape: f32[2,4,600], index: 0, kind: input, shape index: {}]   ;;  %s1477_s1 = inlined_call_operand.vmem [shape: f32[2,4,600], index: 1, kind: input, shape index: {}]   ;;  %s1478_s2 = inlined_call_operand.vmem [shape: f32[4,600], index: 2, kind: input, shape index: {}]   ;;  %s1479_s3 = inlined_call_operand.vmem [shape: f32[2,4,600], index: 3, kind: input, shape index: {}]   ;;  %s1480_s4 = inlined_call_operand.vmem [shape: s32[2,1,600], index: 4, kind: input, shape index: {}]   ;;  %s1481_s5 = inlined_call_operand.vmem [shape: f32[2,1,600], index: 5, kind: output, shape index: {0}]   ;;  %s1482_s6 = inlined_call_operand.vmem [shape: f32[2,1,128], index: 6, kind: output, shape index: {1}]  }
   0x1 LB: > { %s981_s22 = sadd.s32 4294967295, %s1057_s21   ;;  %p985_p0 = scmp.ge.s32.totalorder %s1057_s21, 1  ;;  %s1057_s21 = sphi %s1097_s21, %s17_s21  }
   0x2   : > { %p244_p1 = scmp.lt.s32.totalorder %s1057_s21, 3 }
   0x4   : > { %p245_p2 = pnand %p985_p0, %p244_p1 }
   0x5   : > { %p290_p3 = scmp.lt.s32.totalorder (!%p245_p2), %s981_s22, 1  ;;  %v1483_v0 = vlaneseq (!%p245_p2)  ;;  %v1114_v2 = vld [vmem:[%s1478_s2] sm:$0xff] (!%p245_p2)  ;;  %v1119_v3 = vld [vmem:[%s1478_s2 + $0x8] sm:$0xff] (!%p245_p2)  ;;  %vm355_vm0 = vcmask (!%p245_p2), 1040384   ;;  %vm363_vm1 = vcmask (!%p245_p2), 712704   ;;  %v1059_v20 = vmov (!%p245_p2), 0.0  }
   0x6   : > { %248 = sbr.rel (%p245_p2) target bundleno = 330 (0x14a), region = 40  ;;  %v1132_v4 = vld [vmem:[%s1478_s2 + $0x10] sm:$0xf] (!%p245_p2)  ;;  %v990_v8 = vrot.slane (!%p245_p2), %v1114_v2, 10  ;;  %v991_v12 = vrot.slane (!%p245_p2), %v1119_v3, 10  ;;  %v1060_v24 = vmov (!%p245_p2), 0  }
   0x7   : > { %v1108_v1 = vshrl.u32 (!%p245_p2), %v1483_v0, 7  ;;  %v992_v13 = vrot.slane (!%p245_p2), %v1132_v4, 10  ;;  %vm598_vm6 = vcmask (!%p245_p2), 1043456   ;;  %vm627_vm9 = vcmask (!%p245_p2), 715776  }
   0x9   : > { %v1135_v5 = vsub.s32 (!%p245_p2), 0, %v1108_v1  ;;  %v1138_v6 = vsub.s32 (!%p245_p2), 1, %v1108_v1  ;;  %v1141_v7 = vsub.s32 (!%p245_p2), 2, %v1108_v1  ;;  %v1147_v10 = vsub.s32 (!%p245_p2), 3, %v1108_v1 }
   0xa   : > { %v1150_v11 = vsub.s32 (!%p245_p2), 4, %v1108_v1 }
   0xd   : > { %s1521_s22 = smov (!%p290_p3, %s981_s22), 1 }
   0xe   : > { %s1005_s23 = smul.u32 5, %s1521_s22  ;;  %s315_s29 = scalar_lea.vmem %s1482_s6, %s1521_s22 }
   0xf   : > { %s1122_s28 = smul.u32 20, %s1521_s22 }
  0x10   : > { %s308_s7 = scalar_lea.vmem %s1480_s4, %s1005_s23  ;;  %s312_s24 = scalar_lea.vmem %s1481_s5, %s1005_s23 }
  0x11   : > { %v1144_v9 = vld [vmem:[%s308_s7] sm:$0x1f]  ;;  %s304_s12 = scalar_lea.vmem %s1479_s3, %s1122_s28  ;;  %s1226_s15 = scalar_lea.vmem %s1477_s1, %s1122_s28 }
  0x12   : > { %vm326_vm2 = vcmp.gt.s32.totalorder %v1144_v9, 0  ;;  %v713_v14 = vrot.slane %v1144_v9, %v1135_v5  ;;  %v717_v15 = vrot.slane %v1144_v9, %v1138_v6  ;;  %v721_v16 = vrot.slane %v1144_v9, %v1141_v7  ;;  %v322_v17 = vld [vmem:[%s304_s12] sm:$0xff]  ;;  %v323_v18 = vld [vmem:[%s304_s12 + $0x8] sm:$0xff]  ;;  %v324_v19 = vld [vmem:[%s304_s12 + $0x10] sm:$0xf]  ;;  %s294_s18 = scalar_lea.vmem %s1476_s0, %s1122_s28 }
  0x13   : > { %v989_v21 = vsel %vm326_vm2, 1.0, %v1059_v20  ;;  %v725_v22 = vrot.slane %v1144_v9, %v1147_v10  ;;  %v327_v25 = vsel %vm326_vm2, 1, %v1060_v24  ;;  %v378_v31 = vrot.slane %v322_v17, 6 }
  0x14   : > { %v1170_v26 = vrot.slane %v989_v21, %v1135_v5  ;;  %v1173_v27 = vrot.slane %v989_v21, %v1138_v6  ;;  %v1176_v28 = vrot.slane %v989_v21, %v1141_v7  ;;  %v1179_v29 = vrot.slane %v989_v21, %v1147_v10 }
  0x15   : > { %v1182_v30 = vrot.slane %v989_v21, %v1150_v11  ;;  %v380_v32 = vrot.slane %v323_v18, 6  ;;  %v382_v33 = vrot.slane %v324_v19, 6  ;;  %v396_v42 = vsub.f32 %v322_v17, %v378_v31 }
  0x16   : > { %v356_v34 = vsel %vm355_vm0, %v1170_v26, 0.0  ;;  %v357_v35 = vsel %vm355_vm0, %v1173_v27, 0.0  ;;  %v359_v36 = vsel %vm355_vm0, %v1176_v28, 0.0  ;;  %v361_v37 = vsel %vm355_vm0, %v1179_v29, 0.0 }
  0x17   : > { %v358_v38 = vadd.f32 %v357_v35, %v356_v34  ;;  %v364_v39 = vsel %vm363_vm1, %v1182_v30, 0.0  ;;  %v381_v40 = vrot.slane %v380_v32, 4  ;;  %v383_v41 = vrot.slane %v382_v33, 4 }
  0x18   : > { %v397_v43 = vsub.f32 %v323_v18, %v380_v32  ;;  %v398_v44 = vsub.f32 %v324_v19, %v382_v33  ;;  %v429_v45 = vrot.slane %v327_v25, %v1135_v5  ;;  %v433_v47 = vrot.slane %v327_v25, %v1138_v6 }
  0x19   : > { %v360_v46 = vadd.f32 %v359_v36, %v358_v38  ;;  %v437_v48 = vrot.slane %v327_v25, %v1141_v7  ;;  %v441_v49 = vrot.slane %v327_v25, %v1147_v10  ;;  %v420_v50 = vmul.f32 %v396_v42, %v1114_v2 }
  0x1a   : > { %v421_v51 = vmul.f32 %v397_v43, %v1119_v3  ;;  %v422_v52 = vmul.f32 %v398_v44, %v1132_v4  ;;  %v445_v53 = vrot.slane %v327_v25, %v1150_v11  ;;  %vm1202_vm3 = vcmp.eq.s32.totalorder %v429_v45, 1  ;;  %v1235_v44 = vld [vmem:[%s1226_s15] sm:$0xff]  ;;  %v1243_v45 = vld [vmem:[%s1226_s15 + $0x8] sm:$0xff] }
  0x1b   : > { %v362_v54 = vadd.f32 %v361_v37, %v360_v46  ;;  %vm1206_vm4 = vcmp.eq.s32.totalorder %v433_v47, 1  ;;  %vm1210_vm5 = vcmp.eq.s32.totalorder %v437_v48, 1  ;;  %v423_v58 = vmax.f32 %v420_v50, 1e-08 }
  0x1c   : > { %v424_v59 = vmax.f32 %v421_v51, 1e-08  ;;  %v425_v60 = vmax.f32 %v422_v52, 1e-08  ;;  %v388_v61 = vadd.f32 %v381_v40, %v323_v18  ;;  %vm1214_vm7 = vcmp.eq.s32.totalorder %v441_v49, 1 }
  0x1d   : > { %v365_v62 = vadd.f32 %v364_v39, %v362_v54  ;;  %vm1218_vm8 = vcmp.eq.s32.totalorder %v445_v53, 1  ;;  %v379_v21 = vrot.slane %v378_v31, 4  ;;  %v454_v24 = vcombine.high %v423_v58, %v423_v58 }
  0x1e   : > { %v455_v25 = vcombine.high %v424_v59, %v424_v59  ;;  %v456_v32 = vrot.slane %v423_v58, 2  ;;  %v458_v33 = vrot.slane %v424_v59, 2  ;;  %v460_v18 = vrot.slane %v425_v60, 2  ;;  %v1280_v59 = vld [vmem:[%s294_s18] sm:$0xff]  ;;  %v1282_v60 = vld [vmem:[%s294_s18 + $0x10] sm:$0xf] }
  0x1f   : > { %366 = vadd.xlane.f32.xlu0 %v365_v62  ;;  %v387_v34 = vadd.f32 %v379_v21, %v322_v17  ;;  %v389_v35 = vadd.f32 %v383_v41, %v324_v19  ;;  %v391_v36 = vmul.f32 0.5, %v388_v61  ;;  %v457_v37 = vrot.slane %v454_v24, 2 }
  0x20   : > { %v459_v38 = vrot.slane %v455_v25, 2  ;;  %v466_v31 = vsel %vm1202_vm3, %v456_v32, 1.0  ;;  %v468_v39 = vsel %vm1210_vm5, %v458_v33, 1.0  ;;  %v470_v40 = vsel %vm1218_vm8, %v460_v18, 1.0 }
  0x21   : > { %1025 = vlog2.f32 %v466_v31  ;;  %v390_v42 = vmul.f32 0.5, %v387_v34  ;;  %v392_v43 = vmul.f32 0.5, %v389_v35  ;;  %v467_v17 = vsel %vm1206_vm4, %v457_v37, 1.0 }
  0x22   : > { %v469_v19 = vsel %vm1214_vm7, %v459_v38, 1.0  ;;  %1027 = vlog2.f32 %v468_v39  ;;  %v400_v41 = vsub.f32 %v391_v36, %v1119_v3  ;;  %v1255_v51 = vcombine.high %v1235_v44, %v1235_v44  ;;  %v1266_v3 = vld [vmem:[%s1226_s15 + $0x10] sm:$0xf] }
  0x23   : > { %1029 = vlog2.f32 %v467_v17  ;;  %v399_v46 = vsub.f32 %v390_v42, %v1114_v2  ;;  %v401_v47 = vsub.f32 %v392_v43, %v1132_v4  ;;  %v599_v55 = vsel %vm598_vm6, %v1235_v44, -inf }
  0x24   : > { %1031 = vlog2.f32 %v469_v19  ;;  %v415_v49 = vmul.f32 %v991_v12, %v400_v41  ;;  %v1270_v12 = vcombine.high %v1243_v45, %v1243_v45  ;;  %v606_v56 = vsel %vm598_vm6, %v1255_v51, -inf }
  0x25   : > { %1033 = vlog2.f32 %v470_v40  ;;  %v414_v52 = vmul.f32 %v990_v8, %v399_v46  ;;  %v416_v53 = vmul.f32 %v992_v13, %v401_v47  ;;  %v613_v2 = vsel %vm598_vm6, %v1243_v45, -inf  ;;  %v1278_v8 = vld [vmem:[%s294_s18 + $0x8] sm:$0xff] }
  0x26   : > { %v418_v54 = vmul.f32 10.0, %v415_v49  ;;  %v600_v57 = vrot.slane %v599_v55, 4  ;;  %v607_v58 = vrot.slane %v606_v56, 4  ;;  %v614_v62 = vrot.slane %v613_v2, 4 }
  0x27   : > { %v417_v4 = vmul.f32 10.0, %v414_v52  ;;  %v419_v13 = vmul.f32 10.0, %v416_v53  ;;  %v620_v63 = vsel %vm598_vm6, %v1270_v12, -inf  ;;  %v628_v20 = vsel %vm627_vm9, %v1266_v3, -inf }
  0x28   : > { %v487_v61 = vsub.f32 %v1278_v8, %v418_v54  ;;  %v601_v25 = vmax.f32 %v599_v55, %v600_v57  ;;  %v608_v32 = vmax.f32 %v606_v56, %v607_v58  ;;  %v615_v34 = vmax.f32 %v613_v2, %v614_v62 }
  0x29   : > { %v486_v21 = vsub.f32 %v1280_v59, %v417_v4  ;;  %v488_v24 = vsub.f32 %v1282_v60, %v419_v13  ;;  %v621_v35 = vrot.slane %v620_v63, 4  ;;  %vm1354_vm2 = vcmp.eq.s32.totalorder %v1108_v1, %v713_v14 }
  0x2a   : > { %v490_v33 = vand.u32 2147483647, %v487_v61  ;;  %v496_v18 = vmul.f32 0.5, %v487_v61  ;;  %vm1362_vm3 = vcmp.eq.s32.totalorder %v1108_v1, %v717_v15  ;;  %vm1377_vm4 = vcmp.eq.s32.totalorder %v1108_v1, %v721_v16 }
  0x2b   : > { %v1026_v36 = vpop.eup %1025  ;;  %v489_v37 = vand.u32 2147483647, %v486_v21  ;;  %v491_v38 = vand.u32 2147483647, %v488_v24  ;;  %v495_v31 = vmul.f32 0.5, %v486_v21  ;;  %v497_v39 = vmul.f32 0.5, %v488_v24 }
  0x2c   : > { %v1028_v40 = vpop.eup %1027  ;;  %v472_v42 = vmul.f32 0.6931472, %v1026_v36  ;;  %vm1291_vm10 = vcmp.lt.f32.partialorder %v490_v33, 1.0  ;;  %v1295_v17 = vmul.f32 %v496_v18, %v487_v61  ;;  %v1297_v19 = vadd.f32 -0.5, %v490_v33 }
  0x2d   : > { %v1030_v41 = vpop.eup %1029  ;;  %v476_v46 = vmul.f32 0.6931472, %v1028_v40  ;;  %vm1299_vm11 = vcmp.lt.f32.partialorder %v489_v37, 1.0  ;;  %vm1303_vm12 = vcmp.lt.f32.partialorder %v491_v38, 1.0  ;;  %v1307_v52 = vmul.f32 %v495_v31, %v486_v21 }
  0x2e   : > { %v1032_v53 = vpop.eup %1031  ;;  %v474_v54 = vmul.f32 0.6931472, %v1030_v41  ;;  %v481_v55 = vmul.f32 5.0, %v472_v42  ;;  %v1309_v56 = vmul.f32 %v497_v39, %v488_v24  ;;  %v1311_v2 = vadd.f32 -0.5, %v489_v37 }
  0x2f   : > { %v1034_v4 = vpop.eup %1033  ;;  %v478_v13 = vmul.f32 0.6931472, %v1032_v53  ;;  %v483_v57 = vmul.f32 5.0, %v476_v46  ;;  %v1313_v58 = vadd.f32 -0.5, %v491_v38  ;;  %v505_v61 = vsel %vm1291_vm10, %v1295_v17, %v1297_v19 }
  0x30   : > { %v480_v62 = vmul.f32 0.6931472, %v1034_v4  ;;  %v482_v21 = vmul.f32 5.0, %v474_v54  ;;  %v504_v24 = vsel %vm1299_vm11, %v1307_v52, %v1311_v2  ;;  %v602_v33 = vrot.slane %v601_v25, 2 }
  0x31   : > { %v484_v18 = vmul.f32 5.0, %v478_v13  ;;  %v609_v37 = vrot.slane %v608_v32, 2  ;;  %v616_v38 = vrot.slane %v615_v34, 2  ;;  %v622_v42 = vmax.f32 %v620_v63, %v621_v35 }
  0x32   : > { %v485_v31 = vmul.f32 5.0, %v480_v62  ;;  %v512_v39 = vcombine.low %v481_v55, %v482_v21  ;;  %v603_v40 = vmax.f32 %v601_v25, %v602_v33  ;;  %v629_v54 = vrot.slane %v628_v20, 4 }
  0x33   : > { %v513_v41 = vcombine.low %v483_v57, %v484_v18  ;;  %v610_v46 = vmax.f32 %v608_v32, %v609_v37  ;;  %v617_v53 = vmax.f32 %v615_v34, %v616_v38  ;;  %v623_v2 = vrot.slane %v622_v42, 2 }
  0x34   : > { %v514_v4 = vrot.slane %v512_v39, 6  ;;  %v516_v47 = vrot.slane %v485_v31, 6  ;;  %v604_v52 = vrot.slane %v603_v40, 1  ;;  %v630_v48 = vmax.f32 %v628_v20, %v629_v54 }
  0x35   : > { %v515_v13 = vrot.slane %v513_v41, 6  ;;  %v611_v0 = vrot.slane %v610_v46, 1  ;;  %v618_v50 = vrot.slane %v617_v53, 1  ;;  %v624_v25 = vmax.f32 %v622_v42, %v623_v2 }
  0x36   : > { %v520_v36 = vsub.f32 %v1280_v59, %v514_v4  ;;  %v522_v23 = vsub.f32 %v1282_v60, %v516_v47  ;;  %v1329_v62 = vmax.f32 %v603_v40, %v604_v52  ;;  %v631_v35 = vrot.slane %v630_v48, 2 }
  0x37   : > { %v521_v63 = vsub.f32 %v1278_v8, %v515_v13  ;;  %v1332_v32 = vmax.f32 %v610_v46, %v611_v0  ;;  %v1334_v34 = vmax.f32 %v617_v53, %v618_v50  ;;  %v625_v37 = vrot.slane %v624_v25, 1 }
  0x38   : > { %v523_v55 = vand.u32 2147483647, %v520_v36  ;;  %v525_v57 = vand.u32 2147483647, %v522_v23  ;;  %v529_v21 = vmul.f32 0.5, %v520_v36  ;;  %v531_v33 = vmul.f32 0.5, %v522_v23 }
  0x39   : > { %v524_v18 = vand.u32 2147483647, %v521_v63  ;;  %v530_v20 = vmul.f32 0.5, %v521_v63  ;;  %v632_v59 = vmax.f32 %v630_v48, %v631_v35  ;;  %v1344_v42 = vmax.f32 %v624_v25, %v625_v37 }
  0x3a   : > { %vm1336_vm13 = vcmp.lt.f32.partialorder %v523_v55, 1.0  ;;  %vm1340_vm14 = vcmp.lt.f32.partialorder %v525_v57, 1.0  ;;  %v532_v0 = vmul.f32 %v529_v21, %v520_v36  ;;  %v534_v50 = vmul.f32 %v531_v33, %v522_v23 }
  0x3b   : > { %vm527_vm15 = vcmp.lt.f32.partialorder %v524_v18, 1.0  ;;  %v533_v8 = vmul.f32 %v530_v20, %v521_v63  ;;  %v996_v31 = vadd.f32 -0.5, %v523_v55  ;;  %v997_v39 = vadd.f32 -0.5, %v524_v18 }
  0x3c   : > { %v998_v40 = vadd.f32 -0.5, %v525_v57  ;;  %v633_v41 = vrot.slane %v632_v59, 1  ;;  %v639_v48 = vcombine.low %v1329_v62, %v1332_v32  ;;  %v640_v14 = vcombine.low %v1334_v34, %v1344_v42 }
  0x3d   : > { %v538_v46 = vsel %vm1336_vm13, %v532_v0, %v996_v31  ;;  %v539_v53 = vsel %vm527_vm15, %v533_v8, %v997_v39  ;;  %vm1392_vm5 = vcmp.eq.s32.totalorder %v1108_v1, %v725_v22  ;;  %vm569_vm7 = vcmask 1041408  }
  0x3e   : > { %v540_v54 = vsel %vm1340_vm14, %v534_v50, %v998_v40  ;;  %v999_v4 = vrot.slane %v538_v46, 10  ;;  %v1000_v47 = vrot.slane %v539_v53, 10  ;;  %v1368_v52 = vmax.f32 %v632_v59, %v633_v41 }
  0x3f   : > { %v1001_v5 = vrot.slane %v540_v54, 10  ;;  %v643_v2 = vsub.f32 %v1235_v44, %v639_v48  ;;  %v644_v16 = vsub.f32 %v1243_v45, %v640_v14  ;;  %v1513_v43 = vrot.slane %v1144_v9, %v1150_v11 }
  0x40   : > { %v553_v15 = vadd.f32 %v999_v4, %v504_v24  ;;  %v554_v13 = vadd.f32 %v1000_v47, %v505_v61  ;;  %v645_v25 = vsub.f32 %v1266_v3, %v1368_v52  ;;  %v1516_v10 = vsel %vm1303_vm12, %v1309_v56, %v1313_v58 }
  0x41   : > { %v646_v24 = vmul.f32 1.442695, %v643_v2  ;;  %vm1401_vm8 = vcmp.eq.s32.totalorder %v1108_v1, %v1513_v43  ;;  %v555_v22 = vadd.f32 %v1001_v5, %v1516_v10  ;;  %v1517_v19 = vcombine.low %v1170_v26, %v1173_v27 }
  0x42   : > { %v1518_v63 = vcombine.low %v1176_v28, %v1179_v29  ;;  %v650_v9 = vmul.f32 1.442695, %v645_v25  ;;  %v648_v11 = vmul.f32 1.442695, %v644_v16  ;;  %vm577_vm10 = vcmask 713728  }
  0x43   : > { %v560_v61 = vmul.f32 %v1517_v19, %v553_v15  ;;  %1035 = vpow2.f32 %v646_v24  ;;  %v562_v49 = vmul.f32 %v555_v22, %v1182_v30  ;;  %v735_v59 = vsel %vm1354_vm2, %v1235_v44, 0.0 }
  0x44   : > { %v561_v35 = vmul.f32 %v1518_v63, %v554_v13  ;;  %1037 = vpow2.f32 %v648_v11  ;;  %v736_v38 = vsel %vm1362_vm3, %v1255_v51, 0.0  ;;  %v737_v0 = vsel %vm1377_vm4, %v1243_v45, 0.0 }
  0x45   : > { %v565_v55 = vcombine.high %v560_v61, %v560_v61  ;;  %v570_v21 = vsel %vm569_vm7, %v560_v61, 0.0  ;;  %1039 = vpow2.f32 %v650_v9  ;;  %v578_v37 = vsel %vm577_vm10, %v562_v49, 0.0 }
  0x46   : > { %v566_v57 = vcombine.high %v561_v35, %v561_v35  ;;  %v573_v58 = vsel %vm569_vm7, %v561_v35, 0.0  ;;  %v740_v31 = vsel %vm598_vm6, %v735_v59, 0.0  ;;  %v738_v44 = vsel %vm1392_vm5, %v1270_v12, 0.0 }
  0x47   : > { %v571_v56 = vsel %vm569_vm7, %v565_v55, 0.0  ;;  %v739_v51 = vsel %vm1401_vm8, %v1266_v3, 0.0  ;;  %v747_v45 = vsel %vm598_vm6, %v736_v38, 0.0  ;;  %v754_v46 = vsel %vm598_vm6, %v737_v0, 0.0 }
  0x48   : > { %v572_v33 = vadd.f32 %v571_v56, %v570_v21  ;;  %v575_v18 = vsel %vm569_vm7, %v566_v57, 0.0  ;;  %v741_v4 = vrot.slane %v740_v31, 4  ;;  %v761_v3 = vsel %vm598_vm6, %v738_v44, 0.0 }
  0x49   : > { %v768_v15 = vsel %vm627_vm9, %v739_v51, 0.0  ;;  %v748_v43 = vrot.slane %v747_v45, 4  ;;  %v755_v17 = vrot.slane %v754_v46, 4  ;;  %v762_v9 = vrot.slane %v761_v3, 4 }
  0x4a   : > { %v574_v20 = vadd.f32 %v573_v58, %v572_v33  ;;  %v742_v35 = vadd.f32 %v741_v4, %v740_v31  ;;  %v769_v11 = vrot.slane %v768_v15, 4 }
  0x4b   : > { %v749_v58 = vadd.f32 %v748_v43, %v747_v45  ;;  %v756_v33 = vadd.f32 %v755_v17, %v754_v46  ;;  %v763_v0 = vadd.f32 %v762_v9, %v761_v3 }
  0x4c   : > { %v576_v60 = vadd.f32 %v575_v18, %v574_v20  ;;  %v743_v38 = vrot.slane %v742_v35, 2 }
  0x4d   : > { %v1036_v50 = vpop.eup %1035  ;;  %v750_v44 = vrot.slane %v749_v58, 2  ;;  %v764_v45 = vrot.slane %v763_v0, 2 }
  0x4e   : > { %v579_v8 = vadd.f32 %v578_v37, %v576_v60  ;;  %v654_v39 = vcombine.high %v1036_v50, %v1036_v50  ;;  %v658_v40 = vsel %vm598_vm6, %v1036_v50, 0.0  ;;  %v1038_v41 = vpop.eup %1037  ;;  %v770_v50 = vadd.f32 %v769_v11, %v768_v15 }
  0x4f   : > { %v659_v48 = vrot.slane %v658_v40, 4  ;;  %v1040_v53 = vpop.eup %1039  ;;  %v655_v23 = vcombine.high %v1038_v41, %v1038_v41  ;;  %v672_v54 = vsel %vm598_vm6, %v1038_v41, 0.0  ;;  %v744_v51 = vadd.f32 %v743_v38, %v742_v35 }
  0x50   : > { %580 = vadd.xlane.f32.xlu0 %v579_v8  ;;  %v665_v36 = vsel %vm598_vm6, %v654_v39, 0.0  ;;  %v673_v5 = vrot.slane %v672_v54, 4  ;;  %v686_v14 = vsel %vm627_vm9, %v1040_v53, 0.0  ;;  %v771_v46 = vrot.slane %v770_v50, 2 }
  0x51   : > { %v660_v47 = vadd.f32 %v659_v48, %v658_v40  ;;  %v666_v12 = vrot.slane %v665_v36, 4  ;;  %v679_v2 = vsel %vm598_vm6, %v655_v23, 0.0  ;;  %v687_v6 = vrot.slane %v686_v14, 4 }
  0x52   : > { %v674_v7 = vadd.f32 %v673_v5, %v672_v54  ;;  %v680_v16 = vrot.slane %v679_v2, 4  ;;  %v757_v48 = vrot.slane %v756_v33, 2  ;;  %v751_v53 = vadd.f32 %v750_v44, %v749_v58 }
  0x53   : > { %v661_v13 = vrot.slane %v660_v47, 2  ;;  %v667_v25 = vadd.f32 %v666_v12, %v665_v36  ;;  %v688_v24 = vadd.f32 %v687_v6, %v686_v14  ;;  %v745_v36 = vrot.slane %v744_v51, 1 }
  0x54   : > { %v675_v19 = vrot.slane %v674_v7, 2  ;;  %v681_v61 = vadd.f32 %v680_v16, %v679_v2  ;;  %v758_v23 = vadd.f32 %v757_v48, %v756_v33  ;;  %v765_v54 = vadd.f32 %v764_v45, %v763_v0 }
  0x55   : > { %v662_v10 = vadd.f32 %v661_v13, %v660_v47  ;;  %v668_v22 = vrot.slane %v667_v25, 2  ;;  %v689_v63 = vrot.slane %v688_v24, 2  ;;  %v772_v4 = vadd.f32 %v771_v46, %v770_v50 }
  0x56   : > { %v676_v21 = vadd.f32 %v675_v19, %v674_v7  ;;  %v682_v49 = vrot.slane %v681_v61, 2  ;;  %v752_v47 = vrot.slane %v751_v53, 1  ;;  %v1061_v12 = vmov 1966171168  }
  0x57   : > { %v663_v55 = vrot.slane %v662_v10, 1  ;;  %v669_v57 = vadd.f32 %v668_v22, %v667_v25  ;;  %v690_v56 = vadd.f32 %v689_v63, %v688_v24  ;;  %v811_v5 = vunpack.c.l.s4 %v1061_v12 }
  0x58   : > { %v677_v37 = vrot.slane %v676_v21, 1  ;;  %v683_v59 = vadd.f32 %v682_v49, %v681_v61  ;;  %v759_v2 = vrot.slane %v758_v23, 1  ;;  %v746_v3 = vadd.f32 %v745_v36, %v744_v51 }
  0x59   : > { %v664_v18 = vadd.f32 %v663_v55, %v662_v10  ;;  %v670_v20 = vrot.slane %v669_v57, 1  ;;  %v691_v60 = vrot.slane %v690_v56, 1  ;;  %v766_v15 = vrot.slane %v765_v54, 1 }
  0x5a   : > { %v678_v39 = vadd.f32 %v677_v37, %v676_v21  ;;  %v684_v31 = vrot.slane %v683_v59, 1  ;;  %v773_v25 = vrot.slane %v772_v4, 1  ;;  %v753_v43 = vadd.f32 %v752_v47, %v751_v53 }
  0x5b   : > { %v671_v8 = vadd.f32 %v670_v20, %v669_v57  ;;  %1041 = vlog2.f32 %v664_v18  ;;  %v692_v40 = vadd.f32 %v691_v60, %v690_v56  ;;  %v812_v17 = vunpack.c.0.s8 %v811_v5 }
  0x5c   : > { %v685_v41 = vadd.f32 %v684_v31, %v683_v59  ;;  %v760_v19 = vadd.f32 %v759_v2, %v758_v23  ;;  %v767_v9 = vadd.f32 %v766_v15, %v765_v54  ;;  %v774_v21 = vadd.f32 %v773_v25, %v772_v4 }
  0x5d   : > { %1043 = vlog2.f32 %v671_v8  ;;  %v815_v58 = vsub.s32 %v812_v17, %v1108_v1  ;;  %v1519_v48 = vlaneseq }
  0x5e   : > { %1045 = vlog2.f32 %v678_v39 }
  0x5f   : > { %1047 = vlog2.f32 %v685_v41  ;;  %vm850_vm6 = vcmp.lt.s32.totalorder %v1519_v48, 600  ;;  %v854_v17 = vand.u32 127, %v1519_v48 }
  0x60   : > { %1049 = vlog2.f32 %v692_v40 }
  0x61   : > { %vm862_vm9 = vcmp.eq.s32.totalorder %v854_v17, 2 }
  0x65   : > { %v1042_v14 = vpop.eup %1041 }
  0x66   : > { %v694_v6 = vmul.f32 0.6931472, %v1042_v14 }
  0x67   : > { %v1044_v13 = vpop.eup %1043 }
  0x68   : > { %v1046_v7 = vpop.eup %1045  ;;  %v696_v16 = vmul.f32 0.6931472, %v1044_v13  ;;  %v703_v24 = vadd.f32 %v694_v6, %v1329_v62 }
  0x69   : > { %v1048_v10 = vpop.eup %1047  ;;  %v698_v22 = vmul.f32 0.6931472, %v1046_v7 }
  0x6a   : > { %v1050_v61 = vpop.eup %1049  ;;  %v700_v63 = vmul.f32 0.6931472, %v1048_v10  ;;  %v704_v35 = vadd.f32 %v696_v16, %v1332_v32  ;;  %v775_v11 = vsub.f32 %v703_v24, %v746_v3 }
  0x6b   : > { %v702_v55 = vmul.f32 0.6931472, %v1050_v61  ;;  %v705_v57 = vadd.f32 %v698_v22, %v1334_v34 }
  0x6c   : > { %v706_v49 = vadd.f32 %v700_v63, %v1344_v42  ;;  %v776_v56 = vsub.f32 %v704_v35, %v753_v43  ;;  %v780_v62 = vmul.f32 %v775_v11, %v1170_v26 }
  0x6d   : > { %v707_v33 = vadd.f32 %v702_v55, %v1368_v52  ;;  %v777_v18 = vsub.f32 %v705_v57, %v760_v19 }
  0x6e   : > { %v778_v20 = vsub.f32 %v706_v49, %v767_v9  ;;  %v781_v37 = vmul.f32 %v776_v56, %v1173_v27  ;;  %v785_v32 = vsel %vm355_vm0, %v780_v62, 0.0  ;;  %v808_v59 = vcombine.low %v775_v11, %v776_v56 }
  0x6f   : > { %v779_v60 = vsub.f32 %v707_v33, %v774_v21  ;;  %v782_v34 = vmul.f32 %v777_v18, %v1176_v28 }
  0x70   : > { %v783_v38 = vmul.f32 %v778_v20, %v1179_v29  ;;  %v786_v42 = vsel %vm355_vm0, %v781_v37, 0.0  ;;  %v809_v26 = vcombine.low %v777_v18, %v778_v20  ;;  %v816_v0 = vrot.slane %v808_v59, %v815_v58 }
  0x71   : > { %v784_v1 = vmul.f32 %v779_v60, %v1182_v30  ;;  %v787_v52 = vadd.f32 %v786_v42, %v785_v32  ;;  %v788_v50 = vsel %vm355_vm0, %v782_v34, 0.0  ;;  %v830_v8 = vrot.slane %v779_v60, %v815_v58 }
  0x72   : > { %v790_v27 = vsel %vm355_vm0, %v783_v38, 0.0  ;;  %v823_v39 = vrot.slane %v809_v26, %v815_v58  ;;  %vm858_vm0 = vcmp.eq.s32.totalorder %v854_v17, 1 }
  0x73   : > { %v789_v31 = vadd.f32 %v788_v50, %v787_v52  ;;  %v845_v40 = vrot.slane %v830_v8, %v815_v58  ;;  %v792_v28 = vsel %vm363_vm1, %v784_v1, 0.0  ;;  %vm855_vm1 = vcmp.eq.s32.totalorder %v854_v17, 0 }
  0x74   : > { %v831_v44 = vcombine.low %v816_v0, %v823_v39 }
  0x75   : > { %v791_v29 = vadd.f32 %v790_v27, %v789_v31 }
  0x76   : > { %v838_v41 = vrot.slane %v831_v44, %v815_v58 }
  0x77   : > { %v793_v30 = vadd.f32 %v792_v28, %v791_v29 }
  0x78   : > { %v846_v51 = vcombine.low %v838_v41, %v845_v40 }
  0x79   : > { %794 = vadd.xlane.f32.xlu1 %v793_v30 }
  0x7a   : > { %852 = vst.msk [vmem:[%s312_s24] sm:$0x1f] %vm850_vm6, %v846_v51 }
  0xac   : > { %v367_v45 = vpop.xlane.xlu0 %366 }
  0xad   : > { %v368_v46 = vrot.slane %v367_v45, 4 }
  0xaf   : > { %v369_v53 = vadd.f32 %v368_v46, %v367_v45 }
  0xb1   : > { %v370_v23 = vrot.slane %v369_v53, 2 }
  0xb3   : > { %v371_v36 = vadd.f32 %v370_v23, %v369_v53 }
  0xb5   : > { %v372_v54 = vrot.slane %v371_v36, 1 }
  0xb7   : > { %v373_v4 = vadd.f32 %v372_v54, %v371_v36 }
  0xb9   : > { %1006 = vpush %v373_v4 }
  0xdd   : > { %v581_v47 = vpop.xlane.xlu0 %580 }
  0xde   : > { %v582_v12 = vrot.slane %v581_v47, 4 }
  0xe0   : > { %v583_v5 = vadd.f32 %v582_v12, %v581_v47 }
  0xe2   : > { %v584_v14 = vrot.slane %v583_v5, 2 }
  0xe4   : > { %v585_v2 = vadd.f32 %v584_v14, %v583_v5 }
  0xe6   : > { %v586_v6 = vrot.slane %v585_v2, 1 }
  0xe8   : > { %v587_v3 = vadd.f32 %v586_v6, %v585_v2 }
  0xea   : > { %1008 = vpush %v587_v3  ;;  %s1007_s23 = spop %1006 }
  0xeb   : > { %v859_v10 = vstv %s1007_s23 }
  0xec   : > { %v860_v19 = vsel %vm858_vm0, %v859_v10, 0.0 }
 0x106   : > { %v795_v15 = vpop.xlane.xlu1 %794 }
 0x107   : > { %v796_v13 = vrot.slane %v795_v15, 4 }
 0x109   : > { %v797_v25 = vadd.f32 %v796_v13, %v795_v15 }
 0x10b   : > { %v798_v7 = vrot.slane %v797_v25, 2 }
 0x10d   : > { %v799_v16 = vadd.f32 %v798_v7, %v797_v25 }
 0x10f   : > { %v800_v24 = vrot.slane %v799_v16, 1 }
 0x111   : > { %v801_v43 = vadd.f32 %v800_v24, %v799_v16 }
 0x113   : > { %1010 = vpush %v801_v43 }
 0x11b   : > { %s1009_s25 = spop %1008 }
 0x11c   : > { %v856_v22 = vstv %s1009_s25 }
 0x11d   : > { %v857_v61 = vsel %vm855_vm1, %v856_v22, 0.0 }
 0x11e   : > { %v861_v63 = vadd.f32 %v860_v19, %v857_v61 }
 0x144   : > { %s1011_s26 = spop %1010 }
 0x145   : > { %v863_v35 = vstv %s1011_s26 }
 0x146   : > { %v864_v9 = vsel %vm862_vm9, %v863_v35, 0.0 }
 0x147   : > { %v865_v11 = vadd.f32 %v864_v9, %v861_v63 }
 0x149   : > { %866 = vst [vmem:[%s315_s29] sm:$0x1] %v865_v11 }
 0x14a PF: > { %s17_s21 = sadd.s32 1, %s1057_s21  }
 0x14b   : > { %p14_p4 = scmp.ge.s32.totalorder %s17_s21, 4  }
 0x14d   :  { %16 = sbr.rel (!%p14_p4) target bundleno = 1 (0x1), region = 91 }

</bundles_post_ra>
